<compile_context>
chip_gen: v7x
topology: tpu7x:2x2x1
jax: 0.10.0
libtpu: 0.0.40
codegen_flags: <defaults>
</compile_context>

<pallas_src>
import jax
import jax.numpy as jnp
from jax.experimental import pallas as pl
from jax.experimental.pallas import tpu as pltpu


LANE = 128      # TPU vreg lane width: pad matmul / output last dims to this
SUBLANE = 8     # TPU vreg sublane width: minimum row-tile granularity


def _round_up(x, m):
    return ((x + m - 1) // m) * m


def mlp_kernel(x_ref, w1_ref, b1_ref, w2_ref, b2_ref, o_ref):
    """One batch tile: o = relu(x @ w1 + b1) @ w2 + b2 (dropout = identity, eval)."""
    # Cast x f32 -> bf16 in-kernel (VALU slots are idle in this DMA-bound kernel;
    # doing it here avoids a whole extra HBM pass in the wrapper).
    x_bf16 = x_ref[...].astype(jnp.bfloat16)
    # Hidden layer: bf16 operands on the MXU, f32 accumulation.
    h = jnp.dot(x_bf16, w1_ref[...], preferred_element_type=jnp.float32)
    # Bias add + ReLU in f32 (keeps the elementwise path off bf16 for v5e).
    h = jnp.maximum(h + b1_ref[...], 0.0)
    # TODO(synk): training-mode dropout (p=0.5) would need pltpu.prng_* masking here.
    # Output layer: cast activations back to bf16 for the MXU, accumulate in f32.
    o = jnp.dot(h.astype(w2_ref.dtype), w2_ref[...],
                preferred_element_type=jnp.float32)
    # Lane-dense (128-wide) bf16 store: full-width vst, half the writeback bytes.
    o_ref[...] = (o + b2_ref[...]).astype(o_ref.dtype)


def prepare_mlp_params(w1, b1, w2, b2):
    """One-time parameter prep (do at load time, NOT in the per-step hot path).

    Inputs in torch.nn.Linear layout: w1 (D_h, D_in), b1 (D_h,), w2 (D_out, D_h),
    b2 (D_out,). Returns pre-transposed, zero-padded, bf16 weights / f32 biases so
    the forward wrapper does no transposes and every kernel operand is lane-dense.
    """
    d_h, d_in = w1.shape
    d_out = w2.shape[0]
    d_in_p = _round_up(d_in, LANE)
    d_h_p = _round_up(d_h, LANE)
    d_out_p = _round_up(d_out, LANE)

    w1_t = jnp.zeros((d_in_p, d_h_p), jnp.float32).at[:d_in, :d_h].set(w1.T)
    w2_t = jnp.zeros((d_h_p, d_out_p), jnp.float32).at[:d_h, :d_out].set(w2.T)
    b1_p = jnp.zeros((1, d_h_p), jnp.float32).at[0, :d_h].set(b1)
    b2_p = jnp.zeros((1, d_out_p), jnp.float32).at[0, :d_out].set(b2)

    return {
        "w1": w1_t.astype(jnp.bfloat16),
        "b1": b1_p,
        "w2": w2_t.astype(jnp.bfloat16),
        "b2": b2_p,
        "d_in": d_in,
        "d_out": d_out,
    }


def _choose_batch_tiling(n):
    """Row tiling policy.

    * Pad the batch only to the 8-row sublane (waste < 8 rows/tile, and the pad
      is elided entirely when the batch is already 8-aligned).
    * Target ~1024-row tiles: amortizes per-grid-step overhead, and with f32 x
      the double-buffered footprint (~9 MiB) still fits v5e's 16 MiB default
      scoped VMEM (v6e/v7x have 32 MiB scoped by default).
    * Force >=2 grid steps once the batch is >=512 rows so the "parallel" grid
      axis actually gives v7x's second TensorCore work.
    """
    n_sub = _round_up(max(n, 1), SUBLANE)
    target_tm = 1024
    num_tiles = pl.cdiv(n_sub, target_tm)
    if n_sub >= 512:
        num_tiles = max(num_tiles, 2)
    tm = _round_up(pl.cdiv(n_sub, num_tiles), SUBLANE)
    n_pad = tm * num_tiles
    return tm, n_pad


def mlp_forward(x_nchw, params, *, unpad=True):
    """x_nchw: (N, C, H, W) float32. params: output of prepare_mlp_params.

    Returns (N, d_out) f32-comparable bf16 logits if unpad=True.  For maximum
    throughput pass unpad=False to get the padded (n_pad, 128) bf16 slab and let
    the consumer (loss / argmax / next layer) index [:N, :d_out] itself, saving
    an extra HBM pass over the output.
    """
    n = x_nchw.shape[0]
    d_in = params["d_in"]
    d_out = params["d_out"]
    w1, b1, w2, b2 = params["w1"], params["b1"], params["w2"], params["b2"]
    d_in_p, d_h_p = w1.shape
    d_out_p = w2.shape[1]

    # Flatten NCHW -> (N, C*H*W); row-major view (same as torch .view), no copy.
    x2d = x_nchw.reshape(n, -1)
    assert x2d.shape[1] == d_in, "input feature dim mismatch with prepared params"

    tm, n_pad = _choose_batch_tiling(n)

    # Zero-pad rows (to the chosen tiling) and D_in columns (to lane width).
    # NOTE: x stays f32 here -- the bf16 cast happens inside the kernel so x is
    # only streamed from HBM once.
    if n_pad != n or d_in_p != d_in:
        x2d = jnp.pad(x2d, ((0, n_pad - n), (0, d_in_p - d_in)))

    out_padded = pl.pallas_call(
        mlp_kernel,
        out_shape=jax.ShapeDtypeStruct((n_pad, d_out_p), jnp.bfloat16),
        grid=(n_pad // tm,),
        in_specs=[
            # x batch tile (f32, cast in-kernel).  pipeline_mode=pl.Buffered(3)
            # is an optional extra few % here; kept at the default double-buffer.
            pl.BlockSpec((tm, d_in_p), lambda i: (i, 0)),
            pl.BlockSpec((d_in_p, d_h_p), lambda i: (0, 0)),   # w1 (VMEM-resident)
            pl.BlockSpec((1, d_h_p), lambda i: (0, 0)),        # b1
            pl.BlockSpec((d_h_p, d_out_p), lambda i: (0, 0)),  # w2 (VMEM-resident)
            pl.BlockSpec((1, d_out_p), lambda i: (0, 0)),      # b2
        ],
        out_specs=pl.BlockSpec((tm, d_out_p), lambda i: (i, 0)),
        compiler_params=pltpu.CompilerParams(
            # Batch tiles are independent -> shard grid across TensorCores (2 on v7x).
            dimension_semantics=("parallel",),
            # Footprint at tm=1024 (f32 x double-buffered + bf16 weights/out)
            # is ~9 MiB: fits the default scoped VMEM on v5e/v6e/v7x.
        ),
    )(x2d, w1, b1, w2, b2)

    if unpad:
        return out_padded[:n, :d_out]
    return out_padded


if __name__ == "__main__":
    # Small shapes consistent with the module's forward:
    # batch=2, channels=4, spatial=16 -> dim_in = 4*16*16 = 1024
    N, C, H, W = 2, 4, 16, 16
    dim_in = C * H * W
    dim_hidden = 32
    dim_out = 8

    key = jax.random.PRNGKey(0)
    kx, k1, k2, k3, k4 = jax.random.split(key, 5)

    x = jax.random.normal(kx, (N, C, H, W), dtype=jnp.float32)

    # torch.nn.Linear-style init: uniform in +/- 1/sqrt(fan_in).
    bound1 = 1.0 / (dim_in ** 0.5)
    w1 = jax.random.uniform(k1, (dim_hidden, dim_in), jnp.float32, -bound1, bound1)
    b1 = jax.random.uniform(k2, (dim_hidden,), jnp.float32, -bound1, bound1)
    bound2 = 1.0 / (dim_hidden ** 0.5)
    w2 = jax.random.uniform(k3, (dim_out, dim_hidden), jnp.float32, -bound2, bound2)
    b2 = jax.random.uniform(k4, (dim_out,), jnp.float32, -bound2, bound2)

    params = prepare_mlp_params(w1, b1, w2, b2)   # one-time prep: transpose/pad/cast

    # Fast path: get the padded bf16 slab and fuse the [:N, :dim_out] slice into
    # the consumer (here, the reference comparison).
    out_padded = mlp_forward(x, params, unpad=False)
    jax.block_until_ready(out_padded)
    out = out_padded[:N, :dim_out].astype(jnp.float32)
    assert out.shape == (N, dim_out)

    # Reference 1: identical numeric policy (bf16 MXU operands, f32 accumulation,
    # bf16 final store).
    x2d = x.reshape(N, -1)
    h_ref = jnp.dot(x2d.astype(jnp.bfloat16), w1.T.astype(jnp.bfloat16),
                    preferred_element_type=jnp.float32) + b1
    h_ref = jnp.maximum(h_ref, 0.0)
    ref_bf16 = (jnp.dot(h_ref.astype(jnp.bfloat16), w2.T.astype(jnp.bfloat16),
                        preferred_element_type=jnp.float32) + b2)
    ref_bf16 = ref_bf16.astype(jnp.bfloat16).astype(jnp.float32)
    assert jnp.allclose(out, ref_bf16, atol=5e-3, rtol=5e-3), \
        float(jnp.max(jnp.abs(out - ref_bf16)))

    # Reference 2: pure f32 math (bounds the bf16 quantization error).
    ref_f32 = jnp.maximum(x2d @ w1.T + b1, 0.0) @ w2.T + b2
    assert jnp.allclose(out, ref_f32, atol=5e-2, rtol=5e-2), \
        float(jnp.max(jnp.abs(out - ref_f32)))

    # Also check the convenience (sliced) path.
    out_sliced = mlp_forward(x, params)
    jax.block_until_ready(out_sliced)
    assert out_sliced.shape == (N, dim_out)
    assert jnp.allclose(out_sliced.astype(jnp.float32), out)

    print("KERNEL_OK")
</pallas_src>

<mosaic_0001>
module attributes {stable_mosaic.version = 11 : i64} {
  func.func @mlp_kernel(%arg0: i32, %arg1: memref<8x1024xf32, #tpu.memory_space<vmem>>, %arg2: memref<1024x128xbf16, #tpu.memory_space<vmem>>, %arg3: memref<1x128xf32, #tpu.memory_space<vmem>>, %arg4: memref<128x128xbf16, #tpu.memory_space<vmem>>, %arg5: memref<1x128xf32, #tpu.memory_space<vmem>>, %arg6: memref<8x128xbf16, #tpu.memory_space<vmem>>) attributes {dimension_semantics = [#tpu.dimension_semantics<parallel>], iteration_bounds = array<i64: 1>, scalar_prefetch = 0 : i64, scratch_operands = 0 : i64, tpu.core_type = #tpu.core_type<tc>, window_params = [{transform_indices = @transform_0, window_bounds = array<i64: 8, 1024>}, {pipeline_mode = #tpu.pipeline_mode<synchronous>, transform_indices = @transform_1, window_bounds = array<i64: 1024, 128>}, {pipeline_mode = #tpu.pipeline_mode<synchronous>, transform_indices = @transform_2, window_bounds = array<i64: 1, 128>}, {pipeline_mode = #tpu.pipeline_mode<synchronous>, transform_indices = @transform_3, window_bounds = array<i64: 128, 128>}, {pipeline_mode = #tpu.pipeline_mode<synchronous>, transform_indices = @transform_4, window_bounds = array<i64: 1, 128>}, {transform_indices = @transform_5, window_bounds = array<i64: 8, 128>}]} {
    %c0 = arith.constant 0 : index
    %c0_0 = arith.constant 0 : index
    %0 = vector.load %arg1[%c0, %c0_0] : memref<8x1024xf32, #tpu.memory_space<vmem>>, vector<8x1024xf32>
    %1 = arith.truncf %0 : vector<8x1024xf32> to vector<8x1024xbf16>
    %c0_1 = arith.constant 0 : index
    %c0_2 = arith.constant 0 : index
    %2 = vector.load %arg2[%c0_1, %c0_2] : memref<1024x128xbf16, #tpu.memory_space<vmem>>, vector<1024x128xbf16>
    %cst = arith.constant dense<0.000000e+00> : vector<8x128xf32>
    %3 = tpu.matmul %1, %2, %cst {dimension_numbers = #tpu.dot_dimension_numbers<[1], [0], [0], [1], [0, 0, 1, 1], [], []>} : vector<8x1024xbf16>, vector<1024x128xbf16>, vector<8x128xf32> -> vector<8x128xf32>
    %c0_3 = arith.constant 0 : index
    %c0_4 = arith.constant 0 : index
    %4 = vector.load %arg3[%c0_3, %c0_4] : memref<1x128xf32, #tpu.memory_space<vmem>>, vector<1x128xf32>
    %5 = vector.broadcast %4 : vector<1x128xf32> to vector<8x128xf32>
    %6 = arith.addf %3, %5 : vector<8x128xf32>
    %cst_5 = arith.constant 0.000000e+00 : f32
    %7 = vector.broadcast %cst_5 : f32 to vector<8x128xf32>
    %8 = arith.maximumf %6, %7 : vector<8x128xf32>
    %9 = arith.truncf %8 : vector<8x128xf32> to vector<8x128xbf16>
    %c0_6 = arith.constant 0 : index
    %c0_7 = arith.constant 0 : index
    %10 = vector.load %arg4[%c0_6, %c0_7] : memref<128x128xbf16, #tpu.memory_space<vmem>>, vector<128x128xbf16>
    %cst_8 = arith.constant dense<0.000000e+00> : vector<8x128xf32>
    %11 = tpu.matmul %9, %10, %cst_8 {dimension_numbers = #tpu.dot_dimension_numbers<[1], [0], [0], [1], [0, 0, 1, 1], [], []>} : vector<8x128xbf16>, vector<128x128xbf16>, vector<8x128xf32> -> vector<8x128xf32>
    %c0_9 = arith.constant 0 : index
    %c0_10 = arith.constant 0 : index
    %12 = vector.load %arg5[%c0_9, %c0_10] : memref<1x128xf32, #tpu.memory_space<vmem>>, vector<1x128xf32>
    %13 = vector.broadcast %12 : vector<1x128xf32> to vector<8x128xf32>
    %14 = arith.addf %11, %13 : vector<8x128xf32>
    %15 = arith.truncf %14 : vector<8x128xf32> to vector<8x128xbf16>
    %c0_11 = arith.constant 0 : index
    %c0_12 = arith.constant 0 : index
    %16 = vector.load %arg6[%c0_11, %c0_12] : memref<8x128xbf16, #tpu.memory_space<vmem>>, vector<8x128xbf16>
    tpu.vector_store %arg6[%c0_11, %c0_12], %15 {strides = array<i32>} : memref<8x128xbf16, #tpu.memory_space<vmem>>, vector<8x128xbf16>,
    return
  }
  func.func @transform_0(%arg0: i32) -> (i32, i32) {
    %c0_i32 = arith.constant 0 : i32
    %c0_i32_0 = arith.constant 0 : i32
    return %arg0, %c0_i32 : i32, i32
  }
  func.func @transform_1(%arg0: i32) -> (i32, i32) {
    %c0_i32 = arith.constant 0 : i32
    %c0_i32_0 = arith.constant 0 : i32
    %c0_i32_1 = arith.constant 0 : i32
    return %c0_i32, %c0_i32_0 : i32, i32
  }
  func.func @transform_2(%arg0: i32) -> (i32, i32) {
    %c0_i32 = arith.constant 0 : i32
    %c0_i32_0 = arith.constant 0 : i32
    %c0_i32_1 = arith.constant 0 : i32
    return %c0_i32, %c0_i32_0 : i32, i32
  }
  func.func @transform_3(%arg0: i32) -> (i32, i32) {
    %c0_i32 = arith.constant 0 : i32
    %c0_i32_0 = arith.constant 0 : i32
    %c0_i32_1 = arith.constant 0 : i32
    return %c0_i32, %c0_i32_0 : i32, i32
  }
  func.func @transform_4(%arg0: i32) -> (i32, i32) {
    %c0_i32 = arith.constant 0 : i32
    %c0_i32_0 = arith.constant 0 : i32
    %c0_i32_1 = arith.constant 0 : i32
    return %c0_i32, %c0_i32_0 : i32, i32
  }
  func.func @transform_5(%arg0: i32) -> (i32, i32) {
    %c0_i32 = arith.constant 0 : i32
    %c0_i32_0 = arith.constant 0 : i32
    return %arg0, %c0_i32 : i32, i32
  }
}

</mosaic_0001>

<bundles_post_ra>
// kernel: tpu_custom_call.1
= control target key start
LH: loop header
LB: loop body
LE: loop exit
PB: predicated region body
PF: predicated region fallthrough
CT: control target
= control target key end

     0   :  { %10 = vsyncpa [#allocation3], 0  ;;  %s1350_s0 = inlined_call_operand.hbm [shape: f32[8,1024], index: 0, kind: input, shape index: {}]   ;;  %s1351_s1 = inlined_call_operand.hbm [shape: bf16[1024,128], index: 1, kind: input, shape index: {}]   ;;  %s1352_s2 = inlined_call_operand.vmem [shape: f32[1,128], index: 2, kind: input, shape index: {}]   ;;  %s1353_s3 = inlined_call_operand.hbm [shape: bf16[128,128], index: 3, kind: input, shape index: {}]   ;;  %s1354_s4 = inlined_call_operand.vmem [shape: f32[1,128], index: 4, kind: input, shape index: {}]   ;;  %s1355_s5 = inlined_call_operand.hbm [shape: bf16[8,128], index: 5, kind: output, shape index: {}]  }
   0x1   :  { %11 = vsyncpa [#allocation6], 0 }
   0x2   :  { %12 = vsyncpa [#allocation4], 0  ;;  %s1252_s18 = smov [#allocation5]   ;;  %s1158_s22 = scalar_lea.hbm %s1351_s1, 8192 }
   0x3   :  { %s28_s19 = sshll.u32 %s1252_s18, 4  ;;  %p1159_p0 = scmp.ne.s32.totalorder %s1351_s1, %s1158_s22  ;;  %s29_s19 = int_to_ptr.vmem [resolvable:$true] %s28_s19 }
   0x4   :  { %p1162_p1 = scmp.lt.u32.totalorder %s1158_s22, %s1351_s1 }
   0x6   :  { %p1164_p2 = pnand %p1162_p1, %p1159_p0 }
   0x8   :  { %1167 = shalt.err (!%p1164_p2)
}
   0x9   :  { %s1168_s27 = scalar_lea.vmem %s29_s19, 8192  ;;  %p1173_p4 = scmp.lt.s32.totalorder %s29_s19, %s29_s19 }
   0xa   :  { %p1169_p3 = scmp.ne.s32.totalorder %s29_s19, %s1168_s27  ;;  %p1174_p5 = scmp.lt.s32.totalorder %s1168_s27, %s1168_s27 }
   0xc   :  { %p1175_p6 = por %p1174_p5, %p1173_p4 }
   0xe   :  { %p1176_p7 = pnand %p1175_p6, %p1169_p3 }
  0x10   :  { %1179 = shalt.err (!%p1176_p7)
}
  0x11   :  { %s1253_s28 = smov 64   ;;  %s1254_s29 = smov 4  }
  0x12   :  { %34 = dma.hbm_to_vmem [thread:$0]  %s1351_s1, 8192, %s29_s19, [#allocation6], %s1253_s28, %s1253_s28, %s1254_s29  }
  0x13   :  { %s1255_s7 = smov [#allocation2]   ;;  %s1256_s9 = smov [#allocation7]  }
  0x14   :  { %s19_s8 = sshll.u32 %s1255_s7, 4  ;;  %s42_s10 = sshll.u32 %s1256_s9, 4  ;;  %s20_s8 = int_to_ptr.vmem [resolvable:$true] %s19_s8  ;;  %s43_s10 = int_to_ptr.vmem [resolvable:$true] %s42_s10 }
  0x15   :  { %s1180_s13 = scalar_lea.hbm %s1350_s0, 1024 }
  0x16   :  { %p1181_p8 = scmp.ne.s32.totalorder %s1350_s0, %s1180_s13  ;;  %p1184_p9 = scmp.lt.u32.totalorder %s1180_s13, %s1350_s0 }
  0x18   :  { %p1186_p10 = pnand %p1184_p9, %p1181_p8 }
  0x1a   :  { %1189 = shalt.err (!%p1186_p10)
}
  0x1b   :  { %s1190_s1 = scalar_lea.vmem %s20_s8, 1024  ;;  %p1195_p12 = scmp.lt.s32.totalorder %s20_s8, %s20_s8 }
  0x1c   :  { %p1191_p11 = scmp.ne.s32.totalorder %s20_s8, %s1190_s1  ;;  %p1196_p13 = scmp.lt.s32.totalorder %s1190_s1, %s1190_s1 }
  0x1e   :  { %p1197_p0 = por %p1196_p13, %p1195_p12 }
  0x20   :  { %p1198_p1 = pnand %p1197_p0, %p1191_p11 }
  0x22   :  { %1201 = shalt.err (!%p1198_p1)
}
  0x23   :  { %22 = dma.hbm_to_vmem [thread:$0]  %s1350_s0, 1024, %s20_s8, [#allocation3]  }
  0x24   :  { %s1202_s22 = scalar_lea.hbm %s1353_s3, 1024 }
  0x25   :  { %p1203_p2 = scmp.ne.s32.totalorder %s1353_s3, %s1202_s22  ;;  %p1206_p3 = scmp.lt.u32.totalorder %s1202_s22, %s1353_s3 }
  0x27   :  { %p1208_p4 = pnand %p1206_p3, %p1203_p2 }
  0x29   :  { %1211 = shalt.err (!%p1208_p4)
}
  0x2a   :  { %s1212_s27 = scalar_lea.vmem %s43_s10, 1024  ;;  %p1217_p6 = scmp.lt.s32.totalorder %s43_s10, %s43_s10 }
  0x2b   :  { %p1213_p5 = scmp.ne.s32.totalorder %s43_s10, %s1212_s27  ;;  %p1218_p7 = scmp.lt.s32.totalorder %s1212_s27, %s1212_s27 }
  0x2d   :  { %p1219_p8 = por %p1218_p7, %p1217_p6 }
  0x2f   :  { %p1220_p9 = pnand %p1219_p8, %p1213_p5 }
  0x31   :  { %1223 = shalt.err (!%p1220_p9)
}
  0x32   :  { %48 = dma.hbm_to_vmem [thread:$0]  %s1353_s3, 1024, %s43_s10, [#allocation6], %s1253_s28, %s1253_s28, %s1254_s29  }
  0x33   :  { %1246 = dma.done.wait [#allocation3], 1024  }
  0x34   :  { %1247 = vsyncadd [#allocation3], 4294966272 }
  0x35   :  { %1248 = dma.done.wait [#allocation6], 9216  }
  0x36   :  { %1249 = vsyncadd [#allocation6], 4294958080  ;;  %v1086_v0 = vld [vmem:[#allocation5 + $0x40] sm:$0xff]   ;;  %v1090_v4 = vld [vmem:[#allocation5 + $0x48] sm:$0xff]   ;;  %vm1258_vm0 = vmmov 0   ;;  %s1259_s6 = smov [#allocation8]  }
  0x37   :  { %v1087_v1 = vld [vmem:[#allocation5 + $0xc0] sm:$0xff]   ;;  %961 = vmatprep.subr.bf16.mxu0 %v1086_v0  ;;  %v1091_v5 = vld [vmem:[#allocation5 + $0xc8] sm:$0xff]   ;;  %v1094_v8 = vld [vmem:[#allocation5 + $0x50] sm:$0xff]   ;;  %s877_s7 = sshll.u32 %s1259_s6, 4  ;;  %s878_s7 = int_to_ptr.vmem [resolvable:$true] %s877_s7 }
  0x38   :  { %v1088_v2 = vld [vmem:[#allocation5] sm:$0xff]   ;;  %983 = vmatprep.subr.bf16.mxu1 %v1087_v1  ;;  %v1092_v6 = vld [vmem:[#allocation5 + $0x8] sm:$0xff]   ;;  %v1095_v9 = vld [vmem:[#allocation5 + $0xd0] sm:$0xff]   ;;  %s1224_s8 = scalar_lea.vmem %s878_s7, 64  ;;  %p1229_p11 = scmp.lt.s32.totalorder %s878_s7, %s878_s7 }
  0x39   :  { %v1089_v3 = vld [vmem:[#allocation5 + $0x80] sm:$0xff]   ;;  %962 = vmatpush3.bf16.msra.mxu0 %v1088_v2  ;;  %v1093_v7 = vld [vmem:[#allocation5 + $0x88] sm:$0xff]   ;;  %v1096_v10 = vld [vmem:[#allocation5 + $0x10] sm:$0xff]   ;;  %p1225_p10 = scmp.ne.s32.totalorder %s878_s7, %s1224_s8  ;;  %p1230_p12 = scmp.lt.s32.totalorder %s1224_s8, %s1224_s8 }
  0x3a   :  { %984 = vmatpush3.bf16.msra.mxu1 %v1089_v3  ;;  %963 = vmatprep.subr.bf16.mxu0 %v1090_v4  ;;  %v1097_v11 = vld [vmem:[#allocation5 + $0x90] sm:$0xff]   ;;  %v1098_v12 = vld [vmem:[#allocation5 + $0x58] sm:$0xff]   ;;  %v1102_v16 = vld [vmem:[#allocation5 + $0x60] sm:$0xff]  }
  0x3b   :  { %985 = vmatprep.subr.bf16.mxu1 %v1091_v5  ;;  %v1099_v13 = vld [vmem:[#allocation5 + $0xd8] sm:$0xff]   ;;  %v1103_v17 = vld [vmem:[#allocation5 + $0xe0] sm:$0xff]   ;;  %v1106_v20 = vld [vmem:[#allocation5 + $0x68] sm:$0xff]   ;;  %p1231_p13 = por %p1230_p12, %p1229_p11 }
  0x3c   :  { %v1100_v14 = vld [vmem:[#allocation5 + $0x18] sm:$0xff]   ;;  %v1104_v18 = vld [vmem:[#allocation5 + $0x20] sm:$0xff]   ;;  %v1107_v21 = vld [vmem:[#allocation5 + $0xe8] sm:$0xff]  }
  0x3d   :  { %964 = vmatpush3.bf16.msra.mxu0 %v1092_v6  ;;  %v1101_v15 = vld [vmem:[#allocation5 + $0x98] sm:$0xff]   ;;  %v1105_v19 = vld [vmem:[#allocation5 + $0xa0] sm:$0xff]   ;;  %v1108_v22 = vld [vmem:[#allocation5 + $0x28] sm:$0xff]   ;;  %p1232_p0 = pnand %p1231_p13, %p1225_p10 }
  0x3e   :  { %986 = vmatpush3.bf16.msra.mxu1 %v1093_v7  ;;  %965 = vmatprep.subr.bf16.mxu0 %v1094_v8  ;;  %v1109_v23 = vld [vmem:[#allocation5 + $0xa8] sm:$0xff]   ;;  %v1110_v24 = vld [vmem:[#allocation5 + $0x70] sm:$0xff]   ;;  %v1114_v28 = vld [vmem:[#allocation5 + $0x78] sm:$0xff]  }
  0x3f   :  { %987 = vmatprep.subr.bf16.mxu1 %v1095_v9  ;;  %v1111_v25 = vld [vmem:[#allocation5 + $0xf0] sm:$0xff]   ;;  %v1115_v29 = vld [vmem:[#allocation5 + $0xf8] sm:$0xff]   ;;  %v62_v32 = vld [vmem:[#allocation2 + $0x8] sm:$0xff] }
  0x40   :  { %v1112_v26 = vld [vmem:[#allocation5 + $0x30] sm:$0xff]   ;;  %v1116_v30 = vld [vmem:[#allocation5 + $0x38] sm:$0xff]   ;;  %v61_v34 = vld [vmem:[#allocation2] sm:$0xff]  ;;  %v70_v35 = vpack.c.bf16 %v62_v32, %v62_v32 }
  0x41   :  { %966 = vmatpush3.bf16.msra.mxu0 %v1096_v10  ;;  %v1113_v27 = vld [vmem:[#allocation5 + $0xb0] sm:$0xff]   ;;  %v1117_v31 = vld [vmem:[#allocation5 + $0xb8] sm:$0xff]   ;;  %v69_v37 = vpack.c.bf16 %v61_v34, %v61_v34  ;;  %v1118_v40 = vld [vmem:[#allocation5 + $0x140] sm:$0xff]  }
  0x42   :  { %988 = vmatpush3.bf16.msra.mxu1 %v1097_v11  ;;  %967 = vmatprep.subr.bf16.mxu0 %v1098_v12  ;;  %v64_v33 = vld [vmem:[#allocation2 + $0x18] sm:$0xff]  ;;  %v63_v38 = vld [vmem:[#allocation2 + $0x10] sm:$0xff]  ;;  %v1119_v41 = vld [vmem:[#allocation5 + $0x1c0] sm:$0xff]  }
  0x43   :  { %989 = vmatprep.subr.bf16.mxu1 %v1099_v13  ;;  %v72_v36 = vpack.c.bf16 %v64_v33, %v64_v33  ;;  %v71_v39 = vpack.c.bf16 %v63_v38, %v63_v38  ;;  %628 = vmatprep.mubr.bf16.mxu0 %v70_v35  ;;  %v1120_v42 = vld [vmem:[#allocation5 + $0x100] sm:$0xff]   ;;  %v1122_v44 = vld [vmem:[#allocation5 + $0x148] sm:$0xff]   ;;  %v1126_v48 = vld [vmem:[#allocation5 + $0x150] sm:$0xff]  }
  0x44   :  { %v1121_v43 = vld [vmem:[#allocation5 + $0x180] sm:$0xff]   ;;  %v1123_v45 = vld [vmem:[#allocation5 + $0x1c8] sm:$0xff]   ;;  %v1127_v49 = vld [vmem:[#allocation5 + $0x1d0] sm:$0xff]  }
  0x45   :  { %968 = vmatpush3.bf16.msra.mxu0 %v1100_v14  ;;  %668 = vmatprep.mubr.bf16.mxu1 %v72_v36  ;;  %v1124_v46 = vld [vmem:[#allocation5 + $0x108] sm:$0xff]   ;;  %v1128_v50 = vld [vmem:[#allocation5 + $0x110] sm:$0xff]   ;;  %v1130_v52 = vld [vmem:[#allocation5 + $0x158] sm:$0xff]  }
  0x46   :  { %990 = vmatpush3.bf16.msra.mxu1 %v1101_v15  ;;  %969 = vmatprep.subr.bf16.mxu0 %v1102_v16  ;;  %v1125_v47 = vld [vmem:[#allocation5 + $0x188] sm:$0xff]   ;;  %v1129_v51 = vld [vmem:[#allocation5 + $0x190] sm:$0xff]   ;;  %v1131_v53 = vld [vmem:[#allocation5 + $0x1d8] sm:$0xff]  }
  0x47   :  { %991 = vmatprep.subr.bf16.mxu1 %v1103_v17  ;;  %v1132_v54 = vld [vmem:[#allocation5 + $0x118] sm:$0xff]   ;;  %v1134_v56 = vld [vmem:[#allocation5 + $0x160] sm:$0xff]   ;;  %v1138_v60 = vld [vmem:[#allocation5 + $0x168] sm:$0xff]   ;;  %v1257_v17 = vmov 0.0  }
  0x48   :  { %v1133_v55 = vld [vmem:[#allocation5 + $0x198] sm:$0xff]   ;;  %v1135_v57 = vld [vmem:[#allocation5 + $0x1e0] sm:$0xff]   ;;  %v1139_v61 = vld [vmem:[#allocation5 + $0x1e8] sm:$0xff]  }
  0x49   :  { %970 = vmatpush3.bf16.msra.mxu0 %v1104_v18  ;;  %v1136_v58 = vld [vmem:[#allocation5 + $0x120] sm:$0xff]   ;;  %v1140_v62 = vld [vmem:[#allocation5 + $0x128] sm:$0xff]   ;;  %v1142_v0 = vld [vmem:[#allocation5 + $0x170] sm:$0xff]  }
  0x4a   :  { %992 = vmatpush3.bf16.msra.mxu1 %v1105_v19  ;;  %971 = vmatprep.subr.bf16.mxu0 %v1106_v20  ;;  %v1137_v59 = vld [vmem:[#allocation5 + $0x1a0] sm:$0xff]   ;;  %v1141_v63 = vld [vmem:[#allocation5 + $0x1a8] sm:$0xff]   ;;  %v1143_v1 = vld [vmem:[#allocation5 + $0x1f0] sm:$0xff]  }
  0x4b   :  { %993 = vmatprep.subr.bf16.mxu1 %v1107_v21  ;;  %v1144_v2 = vld [vmem:[#allocation5 + $0x130] sm:$0xff]   ;;  %v1146_v4 = vld [vmem:[#allocation5 + $0x178] sm:$0xff]   ;;  %v66_v8 = vld [vmem:[#allocation2 + $0x28] sm:$0xff] }
  0x4c   :  { %v1145_v3 = vld [vmem:[#allocation5 + $0x1b0] sm:$0xff]   ;;  %v1147_v5 = vld [vmem:[#allocation5 + $0x1f8] sm:$0xff]   ;;  %v74_v10 = vpack.c.bf16 %v66_v8, %v66_v8  ;;  %v65_v12 = vld [vmem:[#allocation2 + $0x20] sm:$0xff] }
  0x4d   :  { %972 = vmatpush3.bf16.msra.mxu0 %v1108_v22  ;;  %v1148_v6 = vld [vmem:[#allocation5 + $0x138] sm:$0xff]   ;;  %v67_v13 = vld [vmem:[#allocation2 + $0x30] sm:$0xff]  ;;  %v73_v14 = vpack.c.bf16 %v65_v12, %v65_v12  ;;  %v1150_v16 = vld [vmem:[#allocation7] sm:$0xff]  }
  0x4e   :  { %994 = vmatpush3.bf16.msra.mxu1 %v1109_v23  ;;  %973 = vmatprep.subr.bf16.mxu0 %v1110_v24  ;;  %v1149_v7 = vld [vmem:[#allocation5 + $0x1b8] sm:$0xff]   ;;  %v75_v15 = vpack.c.bf16 %v67_v13, %v67_v13  ;;  %v1151_v18 = vld [vmem:[#allocation7 + $0x8] sm:$0xff]   ;;  %v1152_v19 = vld [vmem:[#allocation7 + $0x10] sm:$0xff]  }
  0x4f   :  { %995 = vmatprep.subr.bf16.mxu1 %v1111_v25  ;;  %v68_v9 = vld [vmem:[#allocation2 + $0x38] sm:$0xff]  ;;  %v1154_v21 = vld [vmem:[#allocation7 + $0x20] sm:$0xff]   ;;  %v1155_v22 = vld [vmem:[#allocation7 + $0x28] sm:$0xff]  }
  0x50   :  { %v76_v11 = vpack.c.bf16 %v68_v9, %v68_v9  ;;  %v1153_v20 = vld [vmem:[#allocation7 + $0x18] sm:$0xff]   ;;  %v1156_v23 = vld [vmem:[#allocation7 + $0x30] sm:$0xff]  }
  0x51   :  { %974 = vmatpush3.bf16.msra.mxu0 %v1112_v26  ;;  %v1157_v24 = vld [vmem:[#allocation7 + $0x38] sm:$0xff]  }
  0x52   :  { %996 = vmatpush3.bf16.msra.mxu1 %v1113_v27  ;;  %975 = vmatprep.subr.bf16.mxu0 %v1114_v28  ;;  %v887_v27 = vld [vmem:[%s1352_s2] ss:$0 sm:$0xff] }
  0x53   :  { %997 = vmatprep.subr.bf16.mxu1 %v1115_v29 }
  0x55   :  { %976 = vmatpush3.bf16.msra.mxu0 %v1116_v30 }
  0x56   :  { %998 = vmatpush3.bf16.msra.mxu1 %v1117_v31  ;;  %1005 = vmatprep.subr.bf16.mxu0 %v1118_v40 }
  0x57   :  { %1027 = vmatprep.subr.bf16.mxu1 %v1119_v41 }
  0x58   :  { %629 = vmatmul.mubr.bf16.vlgmr.msra.gmra.mrb[0].mxu0 %v69_v37 }
  0x59   :  { %669 = vmatmul.mubr.bf16.vlgmr.msra.gmra.mrb[0].mxu1 %v71_v39  ;;  %1006 = vmatpush3.bf16.msra.mxu0 %v1120_v42 }
  0x5a   :  { %1028 = vmatpush3.bf16.msra.mxu1 %v1121_v43  ;;  %1007 = vmatprep.subr.bf16.mxu0 %v1122_v44 }
  0x5b   :  { %1029 = vmatprep.subr.bf16.mxu1 %v1123_v45  ;;  %708 = vmatprep.mubr.bf16.mxu0 %v74_v10 }
  0x5c   :  { %748 = vmatprep.mubr.bf16.mxu1 %v76_v11 }
  0x5d   :  { %1008 = vmatpush3.bf16.msra.mxu0 %v1124_v46 }
  0x5e   :  { %1030 = vmatpush3.bf16.msra.mxu1 %v1125_v47  ;;  %1009 = vmatprep.subr.bf16.mxu0 %v1126_v48 }
  0x5f   :  { %1031 = vmatprep.subr.bf16.mxu1 %v1127_v49 }
  0x61   :  { %1010 = vmatpush3.bf16.msra.mxu0 %v1128_v50 }
  0x62   :  { %1032 = vmatpush3.bf16.msra.mxu1 %v1129_v51  ;;  %1011 = vmatprep.subr.bf16.mxu0 %v1130_v52  ;;  %v952_v52 = vld [vmem:[%s1354_s4] ss:$0 sm:$0xff] }
  0x63   :  { %1033 = vmatprep.subr.bf16.mxu1 %v1131_v53 }
  0x65   :  { %1012 = vmatpush3.bf16.msra.mxu0 %v1132_v54 }
  0x66   :  { %1034 = vmatpush3.bf16.msra.mxu1 %v1133_v55  ;;  %1013 = vmatprep.subr.bf16.mxu0 %v1134_v56 }
  0x67   :  { %1035 = vmatprep.subr.bf16.mxu1 %v1135_v57 }
  0x69   :  { %1014 = vmatpush3.bf16.msra.mxu0 %v1136_v58 }
  0x6a   :  { %1036 = vmatpush3.bf16.msra.mxu1 %v1137_v59  ;;  %1015 = vmatprep.subr.bf16.mxu0 %v1138_v60 }
  0x6b   :  { %1037 = vmatprep.subr.bf16.mxu1 %v1139_v61 }
  0x6d   :  { %1016 = vmatpush3.bf16.msra.mxu0 %v1140_v62 }
  0x6e   :  { %1038 = vmatpush3.bf16.msra.mxu1 %v1141_v63  ;;  %1017 = vmatprep.subr.bf16.mxu0 %v1142_v0 }
  0x6f   :  { %1039 = vmatprep.subr.bf16.mxu1 %v1143_v1 }
  0x71   :  { %1018 = vmatpush3.bf16.msra.mxu0 %v1144_v2 }
  0x72   :  { %1040 = vmatpush3.bf16.msra.mxu1 %v1145_v3  ;;  %1019 = vmatprep.subr.bf16.mxu0 %v1146_v4 }
  0x73   :  { %1041 = vmatprep.subr.bf16.mxu1 %v1147_v5 }
  0x75   :  { %1020 = vmatpush3.bf16.msra.mxu0 %v1148_v6 }
  0x76   :  { %1042 = vmatpush3.bf16.msra.mxu1 %v1149_v7  ;;  %1058 = vmatprep.subr.bf16.mxu0 %v1257_v17 }
  0x78   :  { %709 = vmatmul.mubr.bf16.vlgmr.msra.gmra.mrb[4].mxu0 %v73_v14 }
  0x79   :  { %749 = vmatmul.mubr.bf16.vlgmr.msra.gmra.mrb[4].mxu1 %v75_v15  ;;  %1059 = vmatpush3.bf16.msra.mxu0 %v1150_v16 }
  0x7a   :  { %1060 = vmatprep.subr.bf16.mxu0 %v1257_v17  ;;  %1074 = vmatprep.mubr.msk.bf16.mxu0 %vm1258_vm0, %v1257_v17 }
  0x7d   :  { %1061 = vmatpush3.bf16.msra.mxu0 %v1151_v18 }
  0x7e   :  { %1062 = vmatprep.subr.bf16.mxu0 %v1257_v17 }
  0x81   :  { %1063 = vmatpush3.bf16.msra.mxu0 %v1152_v19 }
  0x82   :  { %1064 = vmatprep.subr.bf16.mxu0 %v1257_v17 }
  0x85   :  { %1065 = vmatpush3.bf16.msra.mxu0 %v1153_v20 }
  0x86   :  { %1066 = vmatprep.subr.bf16.mxu0 %v1257_v17 }
  0x89   :  { %1067 = vmatpush3.bf16.msra.mxu0 %v1154_v21 }
  0x8a   :  { %1068 = vmatprep.subr.bf16.mxu0 %v1257_v17 }
  0x8d   :  { %1069 = vmatpush3.bf16.msra.mxu0 %v1155_v22 }
  0x8e   :  { %1070 = vmatprep.subr.bf16.mxu0 %v1257_v17 }
  0x91   :  { %1071 = vmatpush3.bf16.msra.mxu0 %v1156_v23 }
  0x92   :  { %1072 = vmatprep.subr.bf16.mxu0 %v1257_v17 }
  0x95   :  { %1073 = vmatpush3.bf16.msra.mxu0 %v1157_v24 }
 0x12b   :  { %v977_v25 = vpop.f32.mrb[0].mxu0 }
 0x12c   :  { %v999_v26 = vpop.f32.mrb[0].mxu1  ;;  %v978_v28 = vpop.f32.mrb[1].mxu0 }
 0x12d   :  { %v1000_v29 = vpop.f32.mrb[1].mxu1  ;;  %v979_v30 = vadd.f32 %v978_v28, %v977_v25  ;;  %v980_v32 = vpop.f32.mrb[2].mxu0 }
 0x12e   :  { %v1001_v31 = vadd.f32 %v1000_v29, %v999_v26  ;;  %v1002_v33 = vpop.f32.mrb[2].mxu1  ;;  %v981_v34 = vpop.f32.mrb[3].mxu0 }
 0x12f   :  { %v1003_v35 = vpop.f32.mrb[3].mxu1  ;;  %v631_v36 = vadd.f32 %v979_v30, %v887_v27 }
 0x131   :  { %v671_v37 = vadd.f32 %v1001_v31, %v631_v36 }
 0x14b   :  { %v1021_v38 = vpop.f32.mrb[4].mxu0 }
 0x14c   :  { %v1043_v39 = vpop.f32.mrb[4].mxu1  ;;  %v1022_v40 = vpop.f32.mrb[5].mxu0 }
 0x14d   :  { %v1023_v41 = vadd.f32 %v1022_v40, %v1021_v38  ;;  %v1044_v42 = vpop.f32.mrb[5].mxu1  ;;  %v1024_v43 = vpop.f32.mrb[6].mxu0 }
 0x14e   :  { %v1045_v44 = vadd.f32 %v1044_v42, %v1043_v39  ;;  %v1046_v45 = vpop.f32.mrb[6].mxu1  ;;  %v1025_v46 = vpop.f32.mrb[7].mxu0 }
 0x14f   :  { %v711_v47 = vadd.f32 %v1023_v41, %v671_v37  ;;  %v1047_v48 = vpop.f32.mrb[7].mxu1 }
 0x151   :  { %v751_v49 = vadd.f32 %v1045_v44, %v711_v47 }
 0x153   :  { %v756_v50 = vmax.f32 %v751_v49, 0.0 }
 0x155   :  { %v757_v51 = vpack.c.bf16 %v756_v50, %v756_v50 }
 0x157   :  { %1075 = vmatmul.mubr.bf16.vlgmr.msra.gmra.mrb[8].mxu0 %v757_v51 }
 0x22a   :  { %v863_v53 = vpop.f32.mrb[8].mxu0 }
 0x22b   :  { %v864_v54 = vadd.f32 %v952_v52, %v863_v53  ;;  %v1076_v55 = vpop.f32.mrb[9].mxu0 }
 0x22c   :  { %v866_v56 = vpop.f32.mrb[10].mxu0 }
 0x22d   :  { %v869_v57 = vpack.c.bf16 %v864_v54, %v864_v54  ;;  %v1077_v58 = vpop.f32.mrb[11].mxu0 }
 0x22f   :  { %870 = vst [vmem:[#allocation8] sm:$0xf] %v869_v57 }
 0x230   :  { %1235 = shalt.err (!%p1232_p0)
}
 0x231   :  { %s1236_s4 = scalar_lea.hbm %s1355_s5, 64 }
 0x232   :  { %p1237_p1 = scmp.ne.s32.totalorder %s1355_s5, %s1236_s4  ;;  %p1240_p2 = scmp.lt.u32.totalorder %s1236_s4, %s1355_s5 }
 0x234   :  { %p1242_p3 = pnand %p1240_p2, %p1237_p1 }
 0x236   :  { %1245 = shalt.err (!%p1242_p3)
}
 0x237   :  { %880 = dma.vmem_to_hbm [thread:$0]  %s878_s7, 64, %s1355_s5, [#allocation4]  }
 0x238   :  { %1250 = dma.done.wait [#allocation4], 64  }
 0x239   :  { %1251 = vsyncadd [#allocation4], 4294967232 }
 0x23a   :  { %884 = vsyncpa [#allocation3], 1 }
 0x23b   :  { %885 = vsyncpa [#allocation6], 1 }
 0x23c   :  { %886 = vsyncpa [#allocation4], 1 }

</bundles_post_ra>
